<compile_context>
chip_gen: v7x
topology: tpu7x:2x2x1
jax: 0.10.0
libtpu: 0.0.40
codegen_flags: <defaults>
</compile_context>

<pallas_src>
import jax
import jax.numpy as jnp
from jax.experimental import pallas as pl
from jax.experimental.pallas import tpu as pltpu


_LANE = 128
# (1024, 128) f32 tile = 512 KiB per buffer; double-buffered in+out stays in a
# few MiB of VMEM on every generation (incl. v7x's 64 MiB per-TC VMEM).
_MAX_TILE_ROWS = 1024


def _slab_layout(n_elem: int):
    """Lane-dense 2D layout for a flattened tensor: (rows_padded, 128)."""
    rows = -(-n_elem // _LANE)                     # ceil(n / 128)
    rows8 = -(-rows // 8) * 8                      # sublane multiple of 8
    tile_rows = min(_MAX_TILE_ROWS, rows8)
    rows_padded = -(-rows8 // tile_rows) * tile_rows
    return rows_padded, tile_rows


def _to_slab(x: jax.Array, rows_padded: int) -> jax.Array:
    """Flatten + zero-pad to (rows_padded, 128), keeping the native dtype."""
    flat = jnp.ravel(x)
    padded = rows_padded * _LANE
    if padded != flat.size:
        flat = jnp.pad(flat, (0, padded - flat.size))
    return flat.reshape(rows_padded, _LANE)


# ----------------------------------------------------------------------------
# Identity forward kernel (ITI_Identity._forward)
# ----------------------------------------------------------------------------
def _identity_kernel(x_ref, o_ref):
    # Whole-tile copy; the grid streams tiles so DMA in/out is pipelined.
    o_ref[...] = x_ref[...]


def iti_identity_forward(x_nchw: jax.Array, dummy_parameter: jax.Array) -> jax.Array:
    """Pallas implementation of ITI_Identity._forward(x) -> x."""
    del dummy_parameter  # unused in forward math, exactly like the PyTorch module
    orig_shape = x_nchw.shape
    orig_dtype = x_nchw.dtype
    n_elem = x_nchw.size

    rows_padded, tile_rows = _slab_layout(n_elem)
    x2d = _to_slab(x_nchw, rows_padded)
    n_bytes = x2d.size * x2d.dtype.itemsize

    out2d = pl.pallas_call(
        _identity_kernel,
        out_shape=jax.ShapeDtypeStruct((rows_padded, _LANE), orig_dtype),
        grid_spec=pl.GridSpec(
            grid=(rows_padded // tile_rows,),
            in_specs=[pl.BlockSpec((tile_rows, _LANE), lambda i: (i, 0))],
            out_specs=pl.BlockSpec((tile_rows, _LANE), lambda i: (i, 0)),
        ),
        # Reuse the input slab's buffer for the output: no extra HBM alloc or
        # writeback target (identity semantics make the alias trivially safe).
        input_output_aliases={0: 0},
        compiler_params=pltpu.CompilerParams(
            dimension_semantics=("parallel",),
        ),
        cost_estimate=pl.CostEstimate(
            flops=0, transcendentals=0, bytes_accessed=2 * n_bytes
        ),
    )(x2d)

    if n_elem == rows_padded * _LANE:
        return out2d.reshape(orig_shape)
    return out2d.reshape(-1)[:n_elem].reshape(orig_shape)


# ----------------------------------------------------------------------------
# ITI.loss: HuberLoss(delta=1.0), mean reduction, as a tiled Pallas reduction.
# ----------------------------------------------------------------------------
def _huber_sum_kernel(a_ref, b_ref, o_ref):
    # Accumulator lives in the (resident) SMEM output across the whole grid.
    @pl.when(pl.program_id(0) == 0)
    def _():
        o_ref[0, 0] = jnp.float32(0.0)

    # Cast per-tile (hides under DMA; keeps HBM traffic in the native dtype).
    d = a_ref[...].astype(jnp.float32) - b_ref[...].astype(jnp.float32)
    ad = jnp.abs(d)
    per_elem = jnp.where(ad <= 1.0, 0.5 * d * d, ad - 0.5)
    # Padded elements of both inputs are zero -> d == 0 -> Huber == 0, so no
    # mask is needed.
    o_ref[0, 0] += jnp.sum(per_elem)


def iti_loss(img1: jax.Array, img2: jax.Array) -> jax.Array:
    """Pallas implementation of ITI.loss(s1, s2) = HuberLoss()(rgb1, rgb2)."""
    assert img1.shape == img2.shape
    n_elem = img1.size

    rows_padded, tile_rows = _slab_layout(n_elem)
    a2d = _to_slab(img1, rows_padded)
    b2d = _to_slab(img2, rows_padded)
    bytes_in = a2d.size * a2d.dtype.itemsize + b2d.size * b2d.dtype.itemsize

    total = pl.pallas_call(
        _huber_sum_kernel,
        out_shape=jax.ShapeDtypeStruct((1, 1), jnp.float32),
        grid_spec=pl.GridSpec(
            grid=(rows_padded // tile_rows,),
            in_specs=[
                pl.BlockSpec((tile_rows, _LANE), lambda i: (i, 0)),
                pl.BlockSpec((tile_rows, _LANE), lambda i: (i, 0)),
            ],
            out_specs=pl.BlockSpec(
                (1, 1), lambda i: (0, 0), memory_space=pltpu.SMEM
            ),
        ),
        compiler_params=pltpu.CompilerParams(
            dimension_semantics=("arbitrary",),  # sequential reduction axis
        ),
        cost_estimate=pl.CostEstimate(
            flops=5 * n_elem, transcendentals=0, bytes_accessed=bytes_in + 4
        ),
    )(a2d, b2d)

    return total[0, 0] / jnp.float32(n_elem)


# ----------------------------------------------------------------------------
# ITI "module" wrapper: forward dispatches over a single Sample or a list of
# Samples exactly like the PyTorch class (ITI_Identity has supportBatch=True,
# so a list is passed through _forward as a whole, i.e. element-wise identity).
# ----------------------------------------------------------------------------
class ITIIdentityPallas:
    def __init__(self):
        self.support_batch = True
        # Deterministic init matching torch.nn.Parameter(torch.tensor(1.0))
        self.dummy_parameter = jnp.float32(1.0)
        self.name = None

    def _forward(self, x):
        if isinstance(x, list):
            return [iti_identity_forward(v, self.dummy_parameter) for v in x]
        return iti_identity_forward(x, self.dummy_parameter)

    def forward(self, x):
        if isinstance(x, list):
            if self.support_batch:
                return self._forward(x)
            return [self._forward(v) for v in x]
        elif isinstance(x, jax.Array):
            return self._forward(x)
        else:
            return x

    __call__ = forward

    @staticmethod
    def loss(img1, img2):
        return iti_loss(img1, img2)


if __name__ == "__main__":
    key = jax.random.PRNGKey(0)
    k1, k2, k3, k4 = jax.random.split(key, 4)

    # Sample RGB images in NCHW, small shapes: batch=2, channels=4, spatial=16
    x = jax.random.normal(k1, (2, 4, 16, 16), dtype=jnp.float32)
    y = jax.random.normal(k2, (2, 4, 16, 16), dtype=jnp.float32)

    iti = ITIIdentityPallas()

    # Forward (identity)
    out = jax.block_until_ready(iti(x))
    assert out.shape == x.shape and out.dtype == x.dtype
    assert bool(jnp.allclose(out, x)), "identity forward mismatch"

    # List-of-samples path
    outs = iti([x, y])
    outs = [jax.block_until_ready(o) for o in outs]
    assert bool(jnp.allclose(outs[0], x)) and bool(jnp.allclose(outs[1], y))

    # Huber loss check against a pure-JAX reference (small case, grid=1)
    loss = jax.block_until_ready(ITIIdentityPallas.loss(x, y))
    d = x - y
    ref = jnp.mean(jnp.where(jnp.abs(d) <= 1.0, 0.5 * d * d, jnp.abs(d) - 0.5))
    assert bool(jnp.allclose(loss, ref, atol=1e-5)), "huber loss mismatch"

    # Exercise the multi-tile (grid > 1) + padding path of both kernels with a
    # modest 3x256x256 image (still tiny; runs in microseconds).
    xb = jax.random.normal(k3, (1, 3, 256, 256), dtype=jnp.float32)
    yb = jax.random.normal(k4, (1, 3, 256, 256), dtype=jnp.float32)
    outb = jax.block_until_ready(iti(xb))
    assert bool(jnp.allclose(outb, xb)), "tiled identity forward mismatch"
    lossb = jax.block_until_ready(ITIIdentityPallas.loss(xb, yb))
    db = xb - yb
    refb = jnp.mean(jnp.where(jnp.abs(db) <= 1.0, 0.5 * db * db, jnp.abs(db) - 0.5))
    assert bool(jnp.allclose(lossb, refb, atol=1e-5)), "tiled huber loss mismatch"

    print("KERNEL_OK")
</pallas_src>

<mosaic_0001>
module attributes {stable_mosaic.version = 11 : i64} {
  func.func @_identity_kernel(%arg0: i32, %arg1: memref<16x128xf32, #tpu.memory_space<vmem>>, %arg2: memref<16x128xf32, #tpu.memory_space<vmem>>) attributes {dimension_semantics = [#tpu.dimension_semantics<parallel>], iteration_bounds = array<i64: 1>, scalar_prefetch = 0 : i64, scratch_operands = 0 : i64, tpu.core_type = #tpu.core_type<tc>, window_params = [{transform_indices = @transform_0, window_bounds = array<i64: 16, 128>}, {transform_indices = @transform_1, window_bounds = array<i64: 16, 128>}]} {
    %c0 = arith.constant 0 : index
    %c0_0 = arith.constant 0 : index
    %0 = vector.load %arg1[%c0, %c0_0] : memref<16x128xf32, #tpu.memory_space<vmem>>, vector<16x128xf32>
    %c0_1 = arith.constant 0 : index
    %c0_2 = arith.constant 0 : index
    %1 = vector.load %arg2[%c0_1, %c0_2] : memref<16x128xf32, #tpu.memory_space<vmem>>, vector<16x128xf32>
    tpu.vector_store %arg2[%c0_1, %c0_2], %0 {strides = array<i32>} : memref<16x128xf32, #tpu.memory_space<vmem>>, vector<16x128xf32>,
    return
  }
  func.func @transform_0(%arg0: i32) -> (i32, i32) {
    %c0_i32 = arith.constant 0 : i32
    %c0_i32_0 = arith.constant 0 : i32
    return %arg0, %c0_i32 : i32, i32
  }
  func.func @transform_1(%arg0: i32) -> (i32, i32) {
    %c0_i32 = arith.constant 0 : i32
    %c0_i32_0 = arith.constant 0 : i32
    return %arg0, %c0_i32 : i32, i32
  }
}

</mosaic_0001>

<bundles_post_ra>
// kernel: tpu_custom_call.1
= control target key start
LH: loop header
LB: loop body
LE: loop exit
PB: predicated region body
PF: predicated region fallthrough
CT: control target
= control target key end

     0   :  { %6 = vsyncpa [#allocation3], 0  ;;  %s134_s0 = inlined_call_operand.hbm [shape: f32[16,128], index: 0, kind: input, shape index: {}, may-alias: {0,1}]   ;;  %s135_s1 = inlined_call_operand.hbm [shape: f32[16,128], index: 1, kind: output, shape index: {}, may-alias: {0,1}]  }
   0x1   :  { %7 = vsyncpa [#allocation4], 0  ;;  %s96_s6 = smov [#allocation2]   ;;  %s48_s10 = scalar_lea.hbm %s134_s0, 256 }
   0x2   :  { %s13_s7 = sshll.u32 %s96_s6, 4  ;;  %p49_p0 = scmp.ne.s32.totalorder %s134_s0, %s48_s10  ;;  %s14_s7 = int_to_ptr.vmem [resolvable:$true] %s13_s7 }
   0x3   :  { %p52_p1 = scmp.lt.u32.totalorder %s48_s10, %s134_s0 }
   0x5   :  { %p54_p2 = pnand %p52_p1, %p49_p0 }
   0x7   :  { %57 = shalt.err (!%p54_p2)
}
   0x8   :  { %s58_s15 = scalar_lea.vmem %s14_s7, 256  ;;  %p63_p4 = scmp.lt.s32.totalorder %s14_s7, %s14_s7 }
   0x9   :  { %p59_p3 = scmp.ne.s32.totalorder %s14_s7, %s58_s15  ;;  %p64_p5 = scmp.lt.s32.totalorder %s58_s15, %s58_s15 }
   0xb   :  { %p65_p6 = por %p64_p5, %p63_p4 }
   0xd   :  { %p66_p7 = pnand %p65_p6, %p59_p3 }
   0xf   :  { %69 = shalt.err (!%p66_p7)
}
  0x10   :  { %s97_s16 = smov 128   ;;  %s98_s17 = smov 8  }
  0x11   :  { %19 = dma.hbm_to_vmem [thread:$0]  %s134_s0, 256, %s14_s7, [#allocation3], %s97_s16, %s97_s16, %s98_s17  }
  0x12   :  { %92 = dma.done.wait [#allocation3], 256  }
  0x13   :  { %93 = vsyncadd [#allocation3], 4294967040  ;;  %s99_s20 = smov [#allocation5]   ;;  %v23_v0 = vld [vmem:[#allocation2] sm:$0xff]  ;;  %v24_v1 = vld [vmem:[#allocation2 + $0x8] sm:$0xff] }
  0x14   :  { %s32_s21 = sshll.u32 %s99_s20, 4  ;;  %25 = vst [vmem:[#allocation5] sm:$0xff] %v23_v0  ;;  %26 = vst [vmem:[#allocation5 + $0x8] sm:$0xff] %v24_v1  ;;  %s33_s21 = int_to_ptr.vmem [resolvable:$true] %s32_s21 }
  0x15   :  { %s70_s22 = scalar_lea.vmem %s33_s21, 256  ;;  %p75_p9 = scmp.lt.s32.totalorder %s33_s21, %s33_s21 }
  0x16   :  { %p71_p8 = scmp.ne.s32.totalorder %s33_s21, %s70_s22  ;;  %p76_p10 = scmp.lt.s32.totalorder %s70_s22, %s70_s22 }
  0x18   :  { %p77_p11 = por %p76_p10, %p75_p9 }
  0x1a   :  { %p78_p12 = pnand %p77_p11, %p71_p8 }
  0x1c   :  { %81 = shalt.err (!%p78_p12)
}
  0x1d   :  { %s82_s0 = scalar_lea.hbm %s135_s1, 256 }
  0x1e   :  { %p83_p13 = scmp.ne.s32.totalorder %s135_s1, %s82_s0  ;;  %p86_p0 = scmp.lt.u32.totalorder %s82_s0, %s135_s1 }
  0x20   :  { %p88_p1 = pnand %p86_p0, %p83_p13 }
  0x22   :  { %91 = shalt.err (!%p88_p1)
}
  0x23   :  { %38 = dma.vmem_to_hbm [thread:$0]  %s33_s21, 256, %s135_s1, [#allocation4], %s97_s16, %s97_s16, %s98_s17  }
  0x24   :  { %94 = dma.done.wait [#allocation4], 256  }
  0x25   :  { %95 = vsyncadd [#allocation4], 4294967040 }
  0x26   :  { %42 = vsyncpa [#allocation3], 1 }
  0x27   :  { %43 = vsyncpa [#allocation4], 1 }

</bundles_post_ra>
